<compile_context>
chip_gen: v7x
topology: tpu7x:2x2x1
jax: 0.10.0
libtpu: 0.0.40
codegen_flags: <defaults>
</compile_context>

<pallas_src>
import jax
import jax.numpy as jnp
from jax.experimental import pallas as pl
from jax.experimental.pallas import tpu as pltpu


def _leaky_relu(x, negative_slope=0.1):
    return jnp.where(x >= 0, x, negative_slope * x)


def _dqn_kernel(x_ref, w1_ref, b1_ref, w2_ref, b2_ref, w3_ref, b3_ref, o_ref):
    x = x_ref[...]  # already f32

    # fc1 + leaky_relu
    h1 = jnp.dot(x, w1_ref[...], preferred_element_type=jnp.float32) + b1_ref[...]
    h1 = _leaky_relu(h1, 0.1)

    # fc2 + leaky_relu
    h2 = jnp.dot(h1, w2_ref[...], preferred_element_type=jnp.float32) + b2_ref[...]
    h2 = _leaky_relu(h2, 0.1)

    # fc3 (no activation)
    out = jnp.dot(h2, w3_ref[...], preferred_element_type=jnp.float32) + b3_ref[...]
    o_ref[...] = out.astype(o_ref.dtype)


def dqn_forward(x, params, tile_b=512):
    """x: [B, obs_dim] float32. params: dict of w1,b1,w2,b2,w3,b3 (w as [in,out])."""
    w1, b1 = params["w1"], params["b1"]
    w2, b2 = params["w2"], params["b2"]
    w3, b3 = params["w3"], params["b3"]

    B, obs_dim = x.shape
    act_dim = w3.shape[1]
    hid1 = w1.shape[1]
    hid2 = w2.shape[1]

    # Batch tile: multiple of 8 (sublane), capped at `tile_b` (VMEM-friendly
    # even on v7x's 64 MiB: 2 buffers * 512*16*4B = 64 KiB for x).
    b_pad8 = max(8, ((B + 7) // 8) * 8)
    tile_b = min(tile_b, b_pad8)
    # Pad batch up to a multiple of the tile so every grid step is full.
    b_total = ((B + tile_b - 1) // tile_b) * tile_b
    if b_total != B:
        x = jnp.pad(x, ((0, b_total - B), (0, 0)))
    num_tiles = b_total // tile_b

    # Weights/biases: full-array blocks with constant index_map -> loaded once,
    # VMEM-resident across all batch tiles.
    resident = lambda a: pl.BlockSpec(a.shape, lambda i: (0,) * a.ndim)

    flops = 2 * b_total * (obs_dim * hid1 + hid1 * hid2 + hid2 * act_dim)
    weight_bytes = sum(int(a.size) * 4 for a in (w1, b1, w2, b2, w3, b3))
    bytes_accessed = b_total * (obs_dim + act_dim) * 4 + weight_bytes

    out = pl.pallas_call(
        _dqn_kernel,
        out_shape=jax.ShapeDtypeStruct((b_total, act_dim), jnp.float32),
        grid=(num_tiles,),
        in_specs=[
            pl.BlockSpec((tile_b, obs_dim), lambda i: (i, 0)),
            resident(w1), resident(b1),
            resident(w2), resident(b2),
            resident(w3), resident(b3),
        ],
        out_specs=pl.BlockSpec((tile_b, act_dim), lambda i: (i, 0)),
        compiler_params=pltpu.CompilerParams(
            dimension_semantics=("parallel",),
        ),
        cost_estimate=pl.CostEstimate(
            flops=flops, transcendentals=0, bytes_accessed=bytes_accessed
        ),
    )(x, w1, b1, w2, b2, w3, b3)

    return out[:B] if b_total != B else out


def init_params(key, obs_dim, act_dim):
    """PyTorch-Linear-style init (uniform +/- 1/sqrt(fan_in)). W stored as [in, out]."""
    def linear(k, fan_in, fan_out):
        kw, kb = jax.random.split(k)
        bound = 1.0 / jnp.sqrt(jnp.float32(fan_in))
        w = jax.random.uniform(kw, (fan_in, fan_out), jnp.float32, -bound, bound)
        b = jax.random.uniform(kb, (1, fan_out), jnp.float32, -bound, bound)
        return w, b

    k1, k2, k3 = jax.random.split(key, 3)
    w1, b1 = linear(k1, obs_dim, 8)
    w2, b2 = linear(k2, 8, 4)
    w3, b3 = linear(k3, 4, act_dim)
    return {"w1": w1, "b1": b1, "w2": w2, "b2": b2, "w3": w3, "b3": b3}


def dqn_reference(x, params):
    """Pure-JAX reference of the PyTorch forward."""
    h = jnp.dot(x, params["w1"]) + params["b1"]
    h = jnp.where(h >= 0, h, 0.1 * h)
    h = jnp.dot(h, params["w2"]) + params["b2"]
    h = jnp.where(h >= 0, h, 0.1 * h)
    return jnp.dot(h, params["w3"]) + params["b3"]


if __name__ == "__main__":
    obs_dim = 16   # observation_space
    act_dim = 4    # action_space
    batch = 64     # small demo batch (multiple of 8); kernel tiles larger batches

    key = jax.random.PRNGKey(0)
    k_params, k_x = jax.random.split(key)

    params = init_params(k_params, obs_dim, act_dim)
    x = jax.random.normal(k_x, (batch, obs_dim), jnp.float32)

    out = dqn_forward(x, params)
    out = jax.block_until_ready(out)

    ref = dqn_reference(x, params)
    assert out.shape == (batch, act_dim)
    assert jnp.allclose(out, ref, atol=1e-5, rtol=1e-5)

    print("KERNEL_OK")
</pallas_src>

<mosaic_0001>
module attributes {stable_mosaic.version = 11 : i64} {
  func.func @_dqn_kernel(%arg0: i32, %arg1: memref<64x16xf32, #tpu.memory_space<vmem>>, %arg2: memref<16x8xf32, #tpu.memory_space<vmem>>, %arg3: memref<1x8xf32, #tpu.memory_space<vmem>>, %arg4: memref<8x4xf32, #tpu.memory_space<vmem>>, %arg5: memref<1x4xf32, #tpu.memory_space<vmem>>, %arg6: memref<4x4xf32, #tpu.memory_space<vmem>>, %arg7: memref<1x4xf32, #tpu.memory_space<vmem>>, %arg8: memref<64x4xf32, #tpu.memory_space<vmem>>) attributes {dimension_semantics = [#tpu.dimension_semantics<parallel>], iteration_bounds = array<i64: 1>, scalar_prefetch = 0 : i64, scratch_operands = 0 : i64, tpu.core_type = #tpu.core_type<tc>, window_params = [{transform_indices = @transform_0, window_bounds = array<i64: 64, 16>}, {pipeline_mode = #tpu.pipeline_mode<synchronous>, transform_indices = @transform_1, window_bounds = array<i64: 16, 8>}, {pipeline_mode = #tpu.pipeline_mode<synchronous>, transform_indices = @transform_2, window_bounds = array<i64: 1, 8>}, {pipeline_mode = #tpu.pipeline_mode<synchronous>, transform_indices = @transform_3, window_bounds = array<i64: 8, 4>}, {pipeline_mode = #tpu.pipeline_mode<synchronous>, transform_indices = @transform_4, window_bounds = array<i64: 1, 4>}, {pipeline_mode = #tpu.pipeline_mode<synchronous>, transform_indices = @transform_5, window_bounds = array<i64: 4, 4>}, {pipeline_mode = #tpu.pipeline_mode<synchronous>, transform_indices = @transform_6, window_bounds = array<i64: 1, 4>}, {transform_indices = @transform_7, window_bounds = array<i64: 64, 4>}]} {
    %c0 = arith.constant 0 : index
    %c0_0 = arith.constant 0 : index
    %0 = vector.load %arg1[%c0, %c0_0] : memref<64x16xf32, #tpu.memory_space<vmem>>, vector<64x16xf32>
    %c0_1 = arith.constant 0 : index
    %c0_2 = arith.constant 0 : index
    %1 = vector.load %arg2[%c0_1, %c0_2] : memref<16x8xf32, #tpu.memory_space<vmem>>, vector<16x8xf32>
    %cst = arith.constant dense<0.000000e+00> : vector<64x8xf32>
    %2 = tpu.matmul %0, %1, %cst {dimension_numbers = #tpu.dot_dimension_numbers<[1], [0], [0], [1], [0, 0, 1, 1], [], []>} : vector<64x16xf32>, vector<16x8xf32>, vector<64x8xf32> -> vector<64x8xf32>
    %c0_3 = arith.constant 0 : index
    %c0_4 = arith.constant 0 : index
    %3 = vector.load %arg3[%c0_3, %c0_4] : memref<1x8xf32, #tpu.memory_space<vmem>>, vector<1x8xf32>
    %4 = vector.broadcast %3 : vector<1x8xf32> to vector<64x8xf32>
    %5 = arith.addf %2, %4 : vector<64x8xf32>
    %cst_5 = arith.constant 0.000000e+00 : f32
    %6 = vector.broadcast %cst_5 : f32 to vector<64x8xf32>
    %7 = arith.cmpf oge, %5, %6 : vector<64x8xf32>
    %cst_6 = arith.constant 1.000000e-01 : f32
    %8 = vector.broadcast %cst_6 : f32 to vector<64x8xf32>
    %9 = arith.mulf %8, %5 : vector<64x8xf32>
    %10 = arith.select %7, %5, %9 : vector<64x8xi1>, vector<64x8xf32>
    %c0_7 = arith.constant 0 : index
    %c0_8 = arith.constant 0 : index
    %11 = vector.load %arg4[%c0_7, %c0_8] : memref<8x4xf32, #tpu.memory_space<vmem>>, vector<8x4xf32>
    %cst_9 = arith.constant dense<0.000000e+00> : vector<64x4xf32>
    %12 = tpu.matmul %10, %11, %cst_9 {dimension_numbers = #tpu.dot_dimension_numbers<[1], [0], [0], [1], [0, 0, 1, 1], [], []>} : vector<64x8xf32>, vector<8x4xf32>, vector<64x4xf32> -> vector<64x4xf32>
    %c0_10 = arith.constant 0 : index
    %c0_11 = arith.constant 0 : index
    %13 = vector.load %arg5[%c0_10, %c0_11] : memref<1x4xf32, #tpu.memory_space<vmem>>, vector<1x4xf32>
    %14 = vector.broadcast %13 : vector<1x4xf32> to vector<64x4xf32>
    %15 = arith.addf %12, %14 : vector<64x4xf32>
    %cst_12 = arith.constant 0.000000e+00 : f32
    %16 = vector.broadcast %cst_12 : f32 to vector<64x4xf32>
    %17 = arith.cmpf oge, %15, %16 : vector<64x4xf32>
    %cst_13 = arith.constant 1.000000e-01 : f32
    %18 = vector.broadcast %cst_13 : f32 to vector<64x4xf32>
    %19 = arith.mulf %18, %15 : vector<64x4xf32>
    %20 = arith.select %17, %15, %19 : vector<64x4xi1>, vector<64x4xf32>
    %c0_14 = arith.constant 0 : index
    %c0_15 = arith.constant 0 : index
    %21 = vector.load %arg6[%c0_14, %c0_15] : memref<4x4xf32, #tpu.memory_space<vmem>>, vector<4x4xf32>
    %cst_16 = arith.constant dense<0.000000e+00> : vector<64x4xf32>
    %22 = tpu.matmul %20, %21, %cst_16 {dimension_numbers = #tpu.dot_dimension_numbers<[1], [0], [0], [1], [0, 0, 1, 1], [], []>} : vector<64x4xf32>, vector<4x4xf32>, vector<64x4xf32> -> vector<64x4xf32>
    %c0_17 = arith.constant 0 : index
    %c0_18 = arith.constant 0 : index
    %23 = vector.load %arg7[%c0_17, %c0_18] : memref<1x4xf32, #tpu.memory_space<vmem>>, vector<1x4xf32>
    %24 = vector.broadcast %23 : vector<1x4xf32> to vector<64x4xf32>
    %25 = arith.addf %22, %24 : vector<64x4xf32>
    %c0_19 = arith.constant 0 : index
    %c0_20 = arith.constant 0 : index
    %26 = vector.load %arg8[%c0_19, %c0_20] : memref<64x4xf32, #tpu.memory_space<vmem>>, vector<64x4xf32>
    tpu.vector_store %arg8[%c0_19, %c0_20], %25 {strides = array<i32>} : memref<64x4xf32, #tpu.memory_space<vmem>>, vector<64x4xf32>,
    return
  }
  func.func @transform_0(%arg0: i32) -> (i32, i32) {
    %c0_i32 = arith.constant 0 : i32
    %c0_i32_0 = arith.constant 0 : i32
    return %arg0, %c0_i32 : i32, i32
  }
  func.func @transform_1(%arg0: i32) -> (i32, i32) {
    %c0_i32 = arith.constant 0 : i32
    %c0_i32_0 = arith.constant 0 : i32
    %c0_i32_1 = arith.constant 0 : i32
    return %c0_i32, %c0_i32_0 : i32, i32
  }
  func.func @transform_2(%arg0: i32) -> (i32, i32) {
    %c0_i32 = arith.constant 0 : i32
    %c0_i32_0 = arith.constant 0 : i32
    %c0_i32_1 = arith.constant 0 : i32
    return %c0_i32, %c0_i32_0 : i32, i32
  }
  func.func @transform_3(%arg0: i32) -> (i32, i32) {
    %c0_i32 = arith.constant 0 : i32
    %c0_i32_0 = arith.constant 0 : i32
    %c0_i32_1 = arith.constant 0 : i32
    return %c0_i32, %c0_i32_0 : i32, i32
  }
  func.func @transform_4(%arg0: i32) -> (i32, i32) {
    %c0_i32 = arith.constant 0 : i32
    %c0_i32_0 = arith.constant 0 : i32
    %c0_i32_1 = arith.constant 0 : i32
    return %c0_i32, %c0_i32_0 : i32, i32
  }
  func.func @transform_5(%arg0: i32) -> (i32, i32) {
    %c0_i32 = arith.constant 0 : i32
    %c0_i32_0 = arith.constant 0 : i32
    %c0_i32_1 = arith.constant 0 : i32
    return %c0_i32, %c0_i32_0 : i32, i32
  }
  func.func @transform_6(%arg0: i32) -> (i32, i32) {
    %c0_i32 = arith.constant 0 : i32
    %c0_i32_0 = arith.constant 0 : i32
    %c0_i32_1 = arith.constant 0 : i32
    return %c0_i32, %c0_i32_0 : i32, i32
  }
  func.func @transform_7(%arg0: i32) -> (i32, i32) {
    %c0_i32 = arith.constant 0 : i32
    %c0_i32_0 = arith.constant 0 : i32
    return %arg0, %c0_i32 : i32, i32
  }
}

</mosaic_0001>

<bundles_post_ra>
// kernel: tpu_custom_call.1
= control target key start
LH: loop header
LB: loop body
LE: loop exit
PB: predicated region body
PF: predicated region fallthrough
CT: control target
= control target key end

     0   :  { %vm43_vm0 = vcmask 130048   ;;  %vm392_vm1 = vcmask 1043456   ;;  %vm205_vm4 = vcmask 64512   ;;  %vm367_vm13 = vcmask 31744   ;;  %s762_s1 = inlined_call_operand.vmem [shape: f32[16,8], index: 1, kind: input, shape index: {}]   ;;  %s763_s0 = inlined_call_operand.vmem [shape: f32[64,16], index: 0, kind: input, shape index: {}]   ;;  %s764_s3 = inlined_call_operand.vmem [shape: f32[8,4], index: 3, kind: input, shape index: {}]   ;;  %s765_s5 = inlined_call_operand.vmem [shape: f32[4,4], index: 5, kind: input, shape index: {}]   ;;  %s766_s2 = inlined_call_operand.vmem [shape: f32[1,8], index: 2, kind: input, shape index: {}]   ;;  %s767_s4 = inlined_call_operand.vmem [shape: f32[1,4], index: 4, kind: input, shape index: {}]   ;;  %s768_s6 = inlined_call_operand.vmem [shape: f32[1,4], index: 6, kind: input, shape index: {}]   ;;  %s769_s7 = inlined_call_operand.vmem [shape: f32[64,4], index: 7, kind: output, shape index: {}]  }
   0x1   :  { %v34_v0 = vld [vmem:[%s762_s1] sm:$0xff]  ;;  %v35_v1 = vld [vmem:[%s762_s1 + $0x8] sm:$0xff]  ;;  %v28_v6 = vld [vmem:[%s763_s0 + $0x10] sm:$0xff] }
   0x2   :  { %v26_v2 = vld [vmem:[%s763_s0] sm:$0xff]  ;;  %v613_v3 = vpack.c.bf16 %v35_v1, %v34_v0  ;;  %v27_v5 = vld [vmem:[%s763_s0 + $0x8] sm:$0xff]  ;;  %v29_v7 = vld [vmem:[%s763_s0 + $0x18] sm:$0xff] }
   0x3   :  { %573 = vmatprep.mubr.msk.f32.mxu0 %vm43_vm0, %v26_v2  ;;  %v197_v4 = vld [vmem:[%s764_s3] sm:$0xff]  ;;  %v31_v9 = vld [vmem:[%s763_s0 + $0x28] sm:$0xff]  ;;  %v32_v10 = vld [vmem:[%s763_s0 + $0x30] sm:$0xff] }
   0x4   :  { %614 = vmatprep.subr.bf16.mxu0 %v613_v3  ;;  %617 = vmatprep.subr.mxu1 %v197_v4  ;;  %v30_v8 = vld [vmem:[%s763_s0 + $0x20] sm:$0xff]  ;;  %v33_v11 = vld [vmem:[%s763_s0 + $0x38] sm:$0xff] }
   0x5   :  { %616 = vmatpush3.bf16.msra.mxu0 %v613_v3  ;;  %618 = vmatpush3.msra.mxu1 %v197_v4  ;;  %v359_v12 = vld [vmem:[%s765_s5] sm:$0xf] }
   0x6   :  { %585 = vmatprep.subr.mxu0 %v197_v4  ;;  %599 = vmatprep.subr.msk.mxu1 %vm392_vm1, %v359_v12  ;;  %v513_v13 = vld [vmem:[%s766_s2] ss:$0 sm:$0xff] }
   0x7   :  { %v522_v46 = vld [vmem:[%s767_s4] ss:$0 sm:$0xff] }
   0x8   :  { %574 = vmatmul.mubr.msk.f32.vlgmr.msra.gmra.mrb[0].mxu0 %vm43_vm0, %v27_v5 }
   0x9   :  { %576 = vmatprep.mubr.msk.f32.mxu0 %vm43_vm0, %v28_v6  ;;  %586 = vmatpush3.msra.mxu0 %v197_v4 }
   0xc   :  { %577 = vmatmul.mubr.msk.f32.gmra.mrb[2].mxu0 %vm43_vm0, %v29_v7 }
   0xd   :  { %579 = vmatprep.mubr.msk.f32.mxu0 %vm43_vm0, %v30_v8 }
  0x10   :  { %580 = vmatmul.mubr.msk.f32.gmra.mrb[4].mxu0 %vm43_vm0, %v31_v9 }
  0x11   :  { %582 = vmatprep.mubr.msk.f32.mxu0 %vm43_vm0, %v32_v10 }
  0x14   :  { %583 = vmatmul.mubr.msk.f32.gmra.mrb[6].mxu0 %vm43_vm0, %v33_v11 }
  0xdb   :  { %v575_v14 = vpop.f32.mrb[0].mxu0 }
  0xdc   :  { %v140_v15 = vadd.f32 %v575_v14, %v513_v13  ;;  %v134_v16 = vpop.f32.mrb[1].mxu0 }
  0xdd   :  { %v135_v17 = vadd.f32 %v513_v13, %v134_v16 }
  0xde   :  { %v182_v18 = vmul.f32 0.1, %v140_v15  ;;  %vm174_vm2 = vcmp.ge.f32.partialorder %v140_v15, 0.0 }
  0xdf   :  { %vm173_vm3 = vcmp.ge.f32.partialorder %v135_v17, 0.0  ;;  %v181_v19 = vmul.f32 0.1, %v135_v17  ;;  %v578_v20 = vpop.f32.mrb[2].mxu0 }
  0xe0   :  { %v150_v21 = vadd.f32 %v578_v20, %v513_v13  ;;  %v144_v22 = vpop.f32.mrb[3].mxu0  ;;  %v190_v25 = vsel %vm174_vm2, %v140_v15, %v182_v18  ;;  %v531_v15 = vld [vmem:[%s768_s6] ss:$0 sm:$0xff] }
  0xe1   :  { %v145_v23 = vadd.f32 %v513_v13, %v144_v22  ;;  %v189_v24 = vsel %vm173_vm3, %v135_v17, %v181_v19 }
  0xe2   :  { %v184_v26 = vmul.f32 0.1, %v150_v21  ;;  %587 = vmatprep.mubr.msk.f32.mxu0 %vm205_vm4, %v189_v24  ;;  %vm176_vm5 = vcmp.ge.f32.partialorder %v150_v21, 0.0 }
  0xe3   :  { %v581_v27 = vpop.f32.mrb[4].mxu0  ;;  %588 = vmatmul.mubr.msk.f32.vlgmr.msra.gmra.mrb[8].mxu0 %vm205_vm4, %v190_v25  ;;  %vm175_vm6 = vcmp.ge.f32.partialorder %v145_v23, 0.0  ;;  %v183_v28 = vmul.f32 0.1, %v145_v23 }
  0xe4   :  { %v160_v29 = vadd.f32 %v581_v27, %v513_v13  ;;  %v154_v30 = vpop.f32.mrb[5].mxu0  ;;  %v192_v34 = vsel %vm176_vm5, %v150_v21, %v184_v26 }
  0xe5   :  { %v155_v31 = vadd.f32 %v513_v13, %v154_v30  ;;  %v191_v32 = vsel %vm175_vm6, %v145_v23, %v183_v28 }
  0xe6   :  { %v186_v33 = vmul.f32 0.1, %v160_v29  ;;  %590 = vmatprep.mubr.msk.f32.mxu1 %vm205_vm4, %v191_v32  ;;  %vm178_vm7 = vcmp.ge.f32.partialorder %v160_v29, 0.0 }
  0xe7   :  { %vm177_vm8 = vcmp.ge.f32.partialorder %v155_v31, 0.0  ;;  %v185_v35 = vmul.f32 0.1, %v155_v31  ;;  %v584_v36 = vpop.f32.mrb[6].mxu0  ;;  %591 = vmatmul.mubr.msk.f32.vlgmr.msra.gmra.mrb[0].mxu1 %vm205_vm4, %v192_v34 }
  0xe8   :  { %v170_v37 = vadd.f32 %v584_v36, %v513_v13  ;;  %v164_v38 = vpop.f32.mrb[7].mxu0  ;;  %600 = vmatpush3.msk.msra.mxu1 %vm392_vm1, %v359_v12  ;;  %v194_v42 = vsel %vm178_vm7, %v160_v29, %v186_v33 }
  0xe9   :  { %v165_v39 = vadd.f32 %v513_v13, %v164_v38  ;;  %v193_v40 = vsel %vm177_vm8, %v155_v31, %v185_v35 }
  0xea   :  { %v188_v41 = vmul.f32 0.1, %v170_v37  ;;  %593 = vmatprep.mubr.msk.f32.mxu1 %vm205_vm4, %v193_v40  ;;  %vm180_vm9 = vcmp.ge.f32.partialorder %v170_v37, 0.0 }
  0xeb   :  { %vm179_vm10 = vcmp.ge.f32.partialorder %v165_v39, 0.0  ;;  %v187_v43 = vmul.f32 0.1, %v165_v39  ;;  %594 = vmatmul.mubr.msk.f32.gmra.mrb[2].mxu1 %vm205_vm4, %v194_v42 }
  0xec   :  { %v196_v45 = vsel %vm180_vm9, %v170_v37, %v188_v41 }
  0xed   :  { %v195_v44 = vsel %vm179_vm10, %v165_v39, %v187_v43 }
  0xee   :  { %596 = vmatprep.mubr.msk.f32.mxu1 %vm205_vm4, %v195_v44 }
  0xef   :  { %597 = vmatmul.mubr.msk.f32.gmra.mrb[4].mxu1 %vm205_vm4, %v196_v45 }
 0x1b6   :  { %v589_v47 = vpop.f32.mrb[8].mxu0 }
 0x1b7   :  { %v302_v48 = vadd.f32 %v589_v47, %v522_v46  ;;  %v296_v49 = vpop.f32.mrb[9].mxu0 }
 0x1b8   :  { %v297_v50 = vadd.f32 %v522_v46, %v296_v49 }
 0x1b9   :  { %v344_v51 = vmul.f32 0.1, %v302_v48  ;;  %vm336_vm11 = vcmp.ge.f32.partialorder %v302_v48, 0.0 }
 0x1ba   :  { %vm335_vm12 = vcmp.ge.f32.partialorder %v297_v50, 0.0  ;;  %v343_v52 = vmul.f32 0.1, %v297_v50  ;;  %v592_v53 = vpop.f32.mrb[0].mxu1 }
 0x1bb   :  { %v312_v54 = vadd.f32 %v592_v53, %v522_v46  ;;  %v306_v55 = vpop.f32.mrb[1].mxu1  ;;  %v352_v58 = vsel %vm336_vm11, %v302_v48, %v344_v51 }
 0x1bc   :  { %v307_v56 = vadd.f32 %v522_v46, %v306_v55  ;;  %v351_v57 = vsel %vm335_vm12, %v297_v50, %v343_v52 }
 0x1bd   :  { %v346_v59 = vmul.f32 0.1, %v312_v54  ;;  %601 = vmatprep.mubr.msk.f32.mxu1 %vm367_vm13, %v351_v57  ;;  %vm338_vm14 = vcmp.ge.f32.partialorder %v312_v54, 0.0 }
 0x1be   :  { %vm337_vm15 = vcmp.ge.f32.partialorder %v307_v56, 0.0  ;;  %v345_v60 = vmul.f32 0.1, %v307_v56  ;;  %v595_v61 = vpop.f32.mrb[2].mxu1  ;;  %602 = vmatmul.mubr.msk.f32.vlgmr.msra.gmra.mrb[6].mxu1 %vm367_vm13, %v352_v58 }
 0x1bf   :  { %v322_v62 = vadd.f32 %v595_v61, %v522_v46  ;;  %v316_v63 = vpop.f32.mrb[3].mxu1  ;;  %v354_v3 = vsel %vm338_vm14, %v312_v54, %v346_v59 }
 0x1c0   :  { %v317_v0 = vadd.f32 %v522_v46, %v316_v63  ;;  %v353_v1 = vsel %vm337_vm15, %v307_v56, %v345_v60 }
 0x1c1   :  { %v348_v2 = vmul.f32 0.1, %v322_v62  ;;  %604 = vmatprep.mubr.msk.f32.mxu1 %vm367_vm13, %v353_v1  ;;  %vm340_vm0 = vcmp.ge.f32.partialorder %v322_v62, 0.0 }
 0x1c2   :  { %vm339_vm1 = vcmp.ge.f32.partialorder %v317_v0, 0.0  ;;  %v347_v4 = vmul.f32 0.1, %v317_v0  ;;  %v598_v5 = vpop.f32.mrb[4].mxu1  ;;  %605 = vmatmul.mubr.msk.f32.gmra.mrb[8].mxu1 %vm367_vm13, %v354_v3 }
 0x1c3   :  { %v332_v6 = vadd.f32 %v598_v5, %v522_v46  ;;  %v326_v7 = vpop.f32.mrb[5].mxu1  ;;  %v356_v11 = vsel %vm340_vm0, %v322_v62, %v348_v2 }
 0x1c4   :  { %v327_v8 = vadd.f32 %v522_v46, %v326_v7  ;;  %v355_v9 = vsel %vm339_vm1, %v317_v0, %v347_v4 }
 0x1c5   :  { %v350_v10 = vmul.f32 0.1, %v332_v6  ;;  %607 = vmatprep.mubr.msk.f32.mxu1 %vm367_vm13, %v355_v9  ;;  %vm342_vm2 = vcmp.ge.f32.partialorder %v332_v6, 0.0 }
 0x1c6   :  { %vm341_vm3 = vcmp.ge.f32.partialorder %v327_v8, 0.0  ;;  %v349_v12 = vmul.f32 0.1, %v327_v8  ;;  %608 = vmatmul.mubr.msk.f32.gmra.mrb[10].mxu1 %vm367_vm13, %v356_v11 }
 0x1c7   :  { %v358_v14 = vsel %vm342_vm2, %v332_v6, %v350_v10 }
 0x1c8   :  { %v357_v13 = vsel %vm341_vm3, %v327_v8, %v349_v12 }
 0x1c9   :  { %610 = vmatprep.mubr.msk.f32.mxu1 %vm367_vm13, %v357_v13 }
 0x1ca   :  { %611 = vmatmul.mubr.msk.f32.gmra.mrb[12].mxu1 %vm367_vm13, %v358_v14 }
 0x291   :  { %v603_v16 = vpop.f32.mrb[6].mxu1 }
 0x292   :  { %v468_v17 = vadd.f32 %v603_v16, %v531_v15  ;;  %v462_v18 = vpop.f32.mrb[7].mxu1 }
 0x293   :  { %v463_v19 = vadd.f32 %v531_v15, %v462_v18 }
 0x294   :  { %502 = vst.msk [vmem:[%s769_s7 + $0x8] sm:$0xff] %vm367_vm13, %v468_v17 }
 0x295   :  { %501 = vst.msk [vmem:[%s769_s7] sm:$0xff] %vm367_vm13, %v463_v19  ;;  %v606_v20 = vpop.f32.mrb[8].mxu1 }
 0x296   :  { %v478_v21 = vadd.f32 %v606_v20, %v531_v15  ;;  %v472_v22 = vpop.f32.mrb[9].mxu1 }
 0x297   :  { %v473_v23 = vadd.f32 %v531_v15, %v472_v22 }
 0x298   :  { %504 = vst.msk [vmem:[%s769_s7 + $0x18] sm:$0xff] %vm367_vm13, %v478_v21 }
 0x299   :  { %503 = vst.msk [vmem:[%s769_s7 + $0x10] sm:$0xff] %vm367_vm13, %v473_v23  ;;  %v609_v24 = vpop.f32.mrb[10].mxu1 }
 0x29a   :  { %v488_v25 = vadd.f32 %v609_v24, %v531_v15  ;;  %v482_v26 = vpop.f32.mrb[11].mxu1 }
 0x29b   :  { %v483_v27 = vadd.f32 %v531_v15, %v482_v26 }
 0x29c   :  { %506 = vst.msk [vmem:[%s769_s7 + $0x28] sm:$0xff] %vm367_vm13, %v488_v25 }
 0x29d   :  { %505 = vst.msk [vmem:[%s769_s7 + $0x20] sm:$0xff] %vm367_vm13, %v483_v27  ;;  %v612_v28 = vpop.f32.mrb[12].mxu1 }
 0x29e   :  { %v498_v29 = vadd.f32 %v612_v28, %v531_v15  ;;  %v492_v30 = vpop.f32.mrb[13].mxu1 }
 0x29f   :  { %v493_v31 = vadd.f32 %v531_v15, %v492_v30 }
 0x2a0   :  { %508 = vst.msk [vmem:[%s769_s7 + $0x38] sm:$0xff] %vm367_vm13, %v498_v29 }
 0x2a1   :  { %507 = vst.msk [vmem:[%s769_s7 + $0x30] sm:$0xff] %vm367_vm13, %v493_v31 }

</bundles_post_ra>
